<compile_context>
chip_gen: v7x
topology: tpu7x:2x2x1
jax: 0.10.0
libtpu: 0.0.40
codegen_flags: <defaults>
</compile_context>

<pallas_src>
import functools

import jax
import jax.numpy as jnp
from jax import lax
from jax.experimental import pallas as pl
from jax.experimental.pallas import tpu as pltpu

_SUBLANE = 8      # f32 sublane tile
_LANE = 128       # lane tile
_MAX_HW_TILE = 128 * _LANE   # caps the in-kernel unroll of the lane-fold loop


def _ceil_to(x, m):
    return (x + m - 1) // m * m


def _static_pow(x, p):
    """x ** p for a static p; small positive integers use a VPU multiply chain."""
    ip = int(p)
    if float(ip) == float(p) and 0 < ip <= 8:
        y = x
        for _ in range(ip - 1):
            y = y * x
        return y
    # TODO(synk): non-integer p falls back to jnp.power's exp/log (EUP) path.
    return jnp.power(x, float(p))


def _to_lane_major(col):
    """(T, 1) sublane-major column -> (1, T) lane-dense row."""
    return jnp.transpose(col, (1, 0))


def _gem_rows_kernel(x_ref, o_ref, *, p, eps, inv_hw, compute_dtype):
    """Row-tiled path: one (tile_rows, HW) block per grid step (full HW)."""
    x = x_ref[...]
    if x.dtype != compute_dtype:
        x = x.astype(compute_dtype)
    x = jnp.maximum(x, jnp.asarray(eps, dtype=compute_dtype))       # clamp(min=eps)
    xp = _static_pow(x, p)
    # Row sums accumulated in f32; single XLU lane reduction per block.
    s = jnp.sum(xp.astype(jnp.float32), axis=-1, keepdims=True)      # (T, 1)
    y = jnp.power(s * inv_hw, 1.0 / p)                               # GeM root
    o_ref[...] = _to_lane_major(y).astype(o_ref.dtype)               # (1, T) store


def _gem_hw_blocked_kernel(x_ref, o_ref, acc_ref, *, p, eps, inv_hw,
                           compute_dtype, hw, hw_tile, n_hw_tiles):
    """Spatial-blocked path: grid = (row_tiles, hw_tiles), hw axis accumulated."""
    k = pl.program_id(1)

    @pl.when(k == 0)
    def _init():
        acc_ref[...] = jnp.zeros_like(acc_ref)

    x = x_ref[...]
    if x.dtype != compute_dtype:
        x = x.astype(compute_dtype)
    x = jnp.maximum(x, jnp.asarray(eps, dtype=compute_dtype))
    xp = _static_pow(x, p)                                   # (T, hw_tile)
    t_rows = xp.shape[0]

    def lane_fold(valid_cols):
        # Fold the first `valid_cols` lanes of xp into a (T, 128) f32 partial
        # sum with pure VALU adds (no per-step cross-lane reduction, no masked
        # narrow stores).  `valid_cols` is static.
        n_full, tail = valid_cols // _LANE, valid_cols % _LANE
        part = None
        for g in range(n_full):
            col = xp[:, g * _LANE:(g + 1) * _LANE].astype(jnp.float32)
            part = col if part is None else part + col
        if tail:
            col = xp[:, n_full * _LANE:(n_full + 1) * _LANE].astype(jnp.float32)
            lane = lax.broadcasted_iota(jnp.int32, (t_rows, _LANE), 1)
            col = jnp.where(lane < tail, col, 0.0)
            part = col if part is None else part + col
        return part

    rem = hw - (n_hw_tiles - 1) * hw_tile        # valid lanes in the last block
    if rem == hw_tile:                            # static: HW divides evenly
        acc_ref[...] += lane_fold(hw_tile)
    else:
        @pl.when(k < n_hw_tiles - 1)
        def _full():
            acc_ref[...] += lane_fold(hw_tile)

        @pl.when(k == n_hw_tiles - 1)
        def _ragged():                            # in-kernel masking, no jnp.pad
            acc_ref[...] += lane_fold(rem)

    @pl.when(k == n_hw_tiles - 1)
    def _finalize():
        s = jnp.sum(acc_ref[...], axis=-1, keepdims=True)    # single XLU reduce
        y = jnp.power(s * inv_hw, 1.0 / p)
        o_ref[...] = _to_lane_major(y).astype(o_ref.dtype)


def _resolve_tuning(block_bytes, vmem_limit_bytes):
    kind = ""
    try:
        kind = jax.devices()[0].device_kind.lower()
    except Exception:
        pass
    is_v7 = ("v7" in kind) or ("7x" in kind)
    is_v5 = "v5" in kind
    if block_bytes is None:
        # Bigger blocks on v7x amortize the ~0.35us per-grid-step overhead
        # against its ~3.2 TB/s HBM; 4 MiB is the measured sweet spot elsewhere.
        block_bytes = (8 if is_v7 else 4) * 1024 * 1024
    if vmem_limit_bytes is None:
        vmem_limit_bytes = (48 if is_v7 else 32) * 1024 * 1024
    return block_bytes, vmem_limit_bytes, is_v5


def _choose_tiling(R, HW, itemsize, block_bytes):
    """Returns (spatial_blocked, tile_rows, hw_tile).  No input padding is used."""
    sub = max(_SUBLANE, 32 // itemsize)            # sublane tile (8 f32 / 16 bf16)
    hw_lanes = _ceil_to(HW, _LANE)                 # VMEM lane-padded width
    row_bytes = hw_lanes * itemsize

    # Whole problem in one block: grid-step overhead would dominate otherwise.
    if _ceil_to(R, sub) * row_bytes <= block_bytes:
        return False, R, HW

    rows_in_budget = block_bytes // row_bytes
    if rows_in_budget >= _LANE:
        # Row-tiled, full spatial extent per block.  tile_rows is a multiple of
        # 128 (keeps the lane-dense output blocks aligned) and we aim for >= 2
        # tiles so both v7x TensorCores get work.
        half = _ceil_to(pl.cdiv(R, 2), _LANE)
        tile_rows = max(_LANE, min(rows_in_budget // _LANE * _LANE, half))
        return False, tile_rows, HW

    # Huge spatial extent: block the spatial axis and accumulate.
    tile_rows = R if R <= _LANE else _LANE
    budget_cols = block_bytes // max(_ceil_to(tile_rows, sub) * itemsize, 1)
    hw_tile = max(_LANE, budget_cols // _LANE * _LANE)
    hw_tile = min(hw_tile, _MAX_HW_TILE, _ceil_to(HW, _LANE))
    if hw_tile >= HW:
        # Spatial blocking degenerated to one HW block: use the simpler
        # row-tiled kernel (no accumulator round trip through VMEM scratch).
        return False, tile_rows, HW
    return True, tile_rows, hw_tile


def _input_block_spec(block_shape, index_map, buffers=None):
    if buffers is not None:
        try:
            return pl.BlockSpec(block_shape, index_map,
                                pipeline_mode=pl.Buffered(buffers))
        except (TypeError, AttributeError):
            pass
    return pl.BlockSpec(block_shape, index_map)


def gem(x, p=3.0, eps=1e-6, *, block_bytes=None, vmem_limit_bytes=None):
    """GeM pooling.  x: (N, C, H, W) -> (N, C, 1, 1)."""
    N, C, H, W = x.shape
    R, HW = N * C, H * W
    pf = float(p)
    if pf == 0.0:
        raise ValueError("GeM requires p != 0 (p must be a static number).")
    itemsize = jnp.dtype(x.dtype).itemsize

    block_bytes, vmem_limit_bytes, is_v5 = _resolve_tuning(block_bytes,
                                                           vmem_limit_bytes)

    ip = int(pf)
    int_p = float(ip) == pf and 0 < ip <= 8
    # bf16-native VPU math keeps bf16 inputs HBM-bound on v6e/v7x; v5e has no
    # bf16 VALU and the non-integer-p pow path wants f32.
    if x.dtype == jnp.bfloat16 and int_p and not is_v5:
        compute_dtype = jnp.bfloat16
    else:
        compute_dtype = jnp.float32

    spatial, tile_rows, hw_tile = _choose_tiling(R, HW, itemsize, block_bytes)
    n_row_tiles = pl.cdiv(R, tile_rows)
    out_cols = n_row_tiles * tile_rows     # ragged R: boundary blocks clipped, sliced below

    x2d = x.reshape(R, HW)                 # no jnp.pad: no extra HBM pass

    cost = pl.CostEstimate(
        flops=R * HW * (2 + (ip - 1 if int_p else 2)) + 2 * R,
        transcendentals=(0 if int_p else 2 * R * HW) + 2 * R,
        bytes_accessed=R * HW * itemsize + R * itemsize)

    if not spatial:
        kernel = functools.partial(
            _gem_rows_kernel, p=pf, eps=float(eps), inv_hw=1.0 / float(HW),
            compute_dtype=compute_dtype)
        grid = (n_row_tiles,)
        in_specs = [pl.BlockSpec((tile_rows, HW), lambda i: (i, 0))]
        out_specs = pl.BlockSpec((1, tile_rows), lambda i: (0, i))
        scratch_shapes = []
        dim_semantics = ("parallel",)
    else:
        n_hw_tiles = pl.cdiv(HW, hw_tile)
        kernel = functools.partial(
            _gem_hw_blocked_kernel, p=pf, eps=float(eps), inv_hw=1.0 / float(HW),
            compute_dtype=compute_dtype, hw=HW, hw_tile=hw_tile,
            n_hw_tiles=n_hw_tiles)
        grid = (n_row_tiles, n_hw_tiles)
        # Strided input tiles: triple-buffer so DMA issue latency stays hidden.
        in_specs = [_input_block_spec((tile_rows, hw_tile),
                                      lambda i, k: (i, k), buffers=3)]
        out_specs = pl.BlockSpec((1, tile_rows), lambda i, k: (0, i))
        scratch_shapes = [pltpu.VMEM((tile_rows, _LANE), jnp.float32)]
        dim_semantics = ("parallel", "arbitrary")
        # TODO(synk): tiny-R / huge-HW shapes put all work on the "arbitrary"
        # axis, idling one v7x TensorCore; a 2-way HW split with a wrapper-side
        # combine of partial sums would fix that.

    out = pl.pallas_call(
        kernel,
        out_shape=jax.ShapeDtypeStruct((1, out_cols), x.dtype),
        grid_spec=pltpu.PrefetchScalarGridSpec(
            num_scalar_prefetch=0,
            grid=grid,
            in_specs=in_specs,
            out_specs=out_specs,
            scratch_shapes=scratch_shapes),
        compiler_params=pltpu.CompilerParams(
            dimension_semantics=dim_semantics,
            vmem_limit_bytes=vmem_limit_bytes),
        cost_estimate=cost,
    )(x2d)

    return out[0, :R].reshape(N, C, 1, 1)


def gem_ref(x, p=3.0, eps=1e-6):
    # Pure-JAX (f32) reference for correctness checking.
    xf = x.astype(jnp.float32)
    xp = jnp.power(jnp.maximum(xf, eps), p)
    return jnp.power(jnp.mean(xp, axis=(-2, -1), keepdims=True), 1.0 / p)


if __name__ == "__main__":
    key = jax.random.PRNGKey(0)

    # 1) Shape implied by the module spec: single full-extent block path.
    x1 = jax.random.normal(key, (2, 4, 16, 16), dtype=jnp.float32)
    y1 = jax.block_until_ready(gem(x1, p=3.0, eps=1e-6))
    r1 = gem_ref(x1, p=3.0, eps=1e-6)
    assert y1.shape == (2, 4, 1, 1), y1.shape
    assert jnp.allclose(y1, r1, atol=1e-5, rtol=1e-5), float(jnp.max(jnp.abs(y1 - r1)))

    # 2) Multi-row-tile path: ragged row count (R=500) and unaligned HW (225),
    #    handled without any wrapper-side padding.
    x2 = jax.random.normal(jax.random.PRNGKey(1), (2, 250, 15, 15), dtype=jnp.float32)
    y2 = jax.block_until_ready(gem(x2, block_bytes=128 * 1024))
    r2 = gem_ref(x2)
    assert jnp.allclose(y2, r2, atol=1e-5, rtol=1e-5), float(jnp.max(jnp.abs(y2 - r2)))

    # 3) Spatial-blocked accumulator path with a ragged last HW block (HW=240),
    #    masked in-kernel.
    x3 = jax.random.normal(jax.random.PRNGKey(2), (2, 4, 12, 20), dtype=jnp.float32)
    y3 = jax.block_until_ready(gem(x3, block_bytes=4 * 1024))
    r3 = gem_ref(x3)
    assert jnp.allclose(y3, r3, atol=1e-5, rtol=1e-5), float(jnp.max(jnp.abs(y3 - r3)))

    # 4) bf16 input (bf16-native VPU math on v6e/v7x, f32 accumulation).
    x4 = jax.random.normal(jax.random.PRNGKey(3), (2, 4, 16, 16), dtype=jnp.bfloat16)
    y4 = jax.block_until_ready(gem(x4))
    r4 = gem_ref(x4)
    assert jnp.allclose(y4.astype(jnp.float32), r4, atol=2e-2, rtol=2e-2), \
        float(jnp.max(jnp.abs(y4.astype(jnp.float32) - r4)))

    print("KERNEL_OK")
</pallas_src>

<mosaic_0001>
module attributes {stable_mosaic.version = 11 : i64} {
  func.func @_gem_rows_kernel(%arg0: i32, %arg1: memref<8x256xf32, #tpu.memory_space<vmem>>, %arg2: memref<1x8xf32, #tpu.memory_space<vmem>>) attributes {dimension_semantics = [#tpu.dimension_semantics<parallel>], iteration_bounds = array<i64: 1>, scalar_prefetch = 0 : i64, scratch_operands = 0 : i64, tpu.core_type = #tpu.core_type<tc>, window_params = [{transform_indices = @transform_0, window_bounds = array<i64: 8, 256>}, {transform_indices = @transform_1, window_bounds = array<i64: 1, 8>}]} {
    %c0 = arith.constant 0 : index
    %c0_0 = arith.constant 0 : index
    %0 = vector.load %arg1[%c0, %c0_0] : memref<8x256xf32, #tpu.memory_space<vmem>>, vector<8x256xf32>
    %cst = arith.constant 9.99999997E-7 : f32
    %1 = vector.broadcast %cst : f32 to vector<8x256xf32>
    %2 = arith.maximumf %0, %1 : vector<8x256xf32>
    %3 = arith.mulf %2, %2 : vector<8x256xf32>
    %4 = arith.mulf %3, %2 : vector<8x256xf32>
    %cst_1 = arith.constant dense<0.000000e+00> : vector<8xf32>
    %5 = vector.multi_reduction <add>, %4, %cst_1 [1] : vector<8x256xf32> to vector<8xf32>
    %6 = vector.shape_cast %5 : vector<8xf32> to vector<8x1xf32>
    %cst_2 = arith.constant 3.906250e-03 : f32
    %7 = vector.broadcast %cst_2 : f32 to vector<8x1xf32>
    %8 = arith.mulf %6, %7 : vector<8x1xf32>
    %cst_3 = arith.constant 0.333333343 : f32
    %9 = vector.broadcast %cst_3 : f32 to vector<8x1xf32>
    %10 = math.powf %8, %9 : vector<8x1xf32>
    %11 = tpu.transpose %10, [1, 0] : vector<8x1xf32> -> vector<1x8xf32>
    %c0_4 = arith.constant 0 : index
    %c0_5 = arith.constant 0 : index
    %12 = vector.load %arg2[%c0_4, %c0_5] : memref<1x8xf32, #tpu.memory_space<vmem>>, vector<1x8xf32>
    tpu.vector_store %arg2[%c0_4, %c0_5], %11 {strides = array<i32>} : memref<1x8xf32, #tpu.memory_space<vmem>>, vector<1x8xf32>,
    return
  }
  func.func @transform_0(%arg0: i32) -> (i32, i32) {
    %c0_i32 = arith.constant 0 : i32
    %c0_i32_0 = arith.constant 0 : i32
    return %arg0, %c0_i32 : i32, i32
  }
  func.func @transform_1(%arg0: i32) -> (i32, i32) {
    %c0_i32 = arith.constant 0 : i32
    %c0_i32_0 = arith.constant 0 : i32
    return %c0_i32, %arg0 : i32, i32
  }
}

</mosaic_0001>

<bundles_post_ra>
// kernel: tpu_custom_call.1
= control target key start
LH: loop header
LB: loop body
LE: loop exit
PB: predicated region body
PF: predicated region fallthrough
CT: control target
= control target key end

     0   :  { %6 = vsyncpa [#allocation3], 0  ;;  %s192_s0 = inlined_call_operand.hbm [shape: f32[8,256], index: 0, kind: input, shape index: {}]   ;;  %s193_s1 = inlined_call_operand.hbm [shape: f32[1,8], index: 1, kind: output, shape index: {}]  }
   0x1   :  { %7 = vsyncpa [#allocation4], 0  ;;  %s156_s6 = smov [#allocation2]   ;;  %s108_s10 = scalar_lea.hbm %s192_s0, 256 }
   0x2   :  { %s14_s7 = sshll.u32 %s156_s6, 4  ;;  %p109_p0 = scmp.ne.s32.totalorder %s192_s0, %s108_s10  ;;  %s15_s7 = int_to_ptr.vmem [resolvable:$true] %s14_s7 }
   0x3   :  { %p112_p1 = scmp.lt.u32.totalorder %s108_s10, %s192_s0 }
   0x5   :  { %p114_p2 = pnand %p112_p1, %p109_p0 }
   0x7   :  { %117 = shalt.err (!%p114_p2)
}
   0x8   :  { %s118_s15 = scalar_lea.vmem %s15_s7, 256  ;;  %p123_p4 = scmp.lt.s32.totalorder %s15_s7, %s15_s7 }
   0x9   :  { %p119_p3 = scmp.ne.s32.totalorder %s15_s7, %s118_s15  ;;  %p124_p5 = scmp.lt.s32.totalorder %s118_s15, %s118_s15 }
   0xb   :  { %p125_p6 = por %p124_p5, %p123_p4 }
   0xd   :  { %p126_p7 = pnand %p125_p6, %p119_p3 }
   0xf   :  { %129 = shalt.err (!%p126_p7)
}
  0x10   :  { %17 = dma.hbm_to_vmem [thread:$0]  %s192_s0, 256, %s15_s7, [#allocation3]  }
  0x11   :  { %152 = dma.done.wait [#allocation3], 256  }
  0x12   :  { %153 = vsyncadd [#allocation3], 4294967040  ;;  %v21_v0 = vld [vmem:[#allocation2] sm:$0xff]  ;;  %v22_v1 = vld [vmem:[#allocation2 + $0x8] sm:$0xff]  ;;  %s157_s0 = smov [#allocation5]   ;;  %vm66_vm5 = vcmask 57344  }
  0x13   :  { %v23_v2 = vmax.f32 %v21_v0, 1e-06  ;;  %v24_v3 = vmax.f32 %v22_v1, 1e-06  ;;  %s74_s18 = sshll.u32 %s157_s0, 4  ;;  %s75_s18 = int_to_ptr.vmem [resolvable:$true] %s74_s18 }
  0x14   :  { %s130_s19 = scalar_lea.vmem %s75_s18, 16  ;;  %s134_s20 = scalar_lea.vmem %s75_s18, 32 }
  0x15   :  { %v25_v4 = vmul.f32 %v23_v2, %v23_v2  ;;  %v26_v5 = vmul.f32 %v24_v3, %v24_v3  ;;  %p131_p8 = scmp.ne.s32.totalorder %s75_s18, %s130_s19  ;;  %p135_p9 = scmp.lt.s32.totalorder %s75_s18, %s75_s18 }
  0x16   :  { %p136_p10 = scmp.lt.s32.totalorder %s134_s20, %s130_s19 }
  0x17   :  { %v27_v6 = vmul.f32 %v25_v4, %v23_v2  ;;  %v28_v7 = vmul.f32 %v26_v5, %v24_v3 }
  0x18   :  { %p137_p11 = por %p136_p10, %p135_p9 }
  0x19   :  { %v29_v8 = vadd.f32 %v28_v7, %v27_v6 }
  0x1a   :  { %p138_p12 = pnand %p137_p11, %p131_p8 }
  0x1b   :  { %30 = vadd.xlane.f32.xlu0 %v29_v8 }
  0xa8   :  { %v31_v9 = vpop.xlane.xlu0 %30 }
  0xa9   :  { %v32_v10 = vmul.f32 0.00390625, %v31_v9 }
  0xab   :  { %v85_v11 = vand.u32 2147483647, %v32_v10  ;;  %v89_v14 = vand.u32 2147483648, %v32_v10  ;;  %vm84_vm2 = vcmp.lt.f32.partialorder %v32_v10, 0.0  ;;  %vm83_vm3 = vcmp.eq.f32.partialorder %v32_v10, 0.0 }
  0xad   :  { %104 = vlog2.f32 %v85_v11  ;;  %vm93_vm0 = vweird.f32 %v85_v11  ;;  %vm95_vm1 = vcmp.eq.f32.partialorder %v85_v11, 0.0  ;;  %vm86_vm4 = vcmp.eq.f32.partialorder %v85_v11, inf }
  0xb7   :  { %v105_v12 = vpop.eup %104 }
  0xb8   :  { %v90_v13 = vmul.f32 0.33333334, %v105_v12 }
  0xba   :  { %106 = vpow2.f32 %v90_v13 }
  0xc4   :  { %v107_v15 = vpop.eup %106 }
  0xc5   :  { %v92_v16 = vor.u32 %v107_v15, %v89_v14 }
  0xc7   :  { %v94_v17 = vsel %vm93_vm0, %v32_v10, %v92_v16 }
  0xc8   :  { %v97_v18 = vsel %vm95_vm1, %v89_v14, %v94_v17 }
  0xc9   :  { %v98_v19 = vsel %vm84_vm2, nan, %v97_v18 }
  0xca   :  { %v99_v20 = vsel %vm83_vm3, 0.0, %v98_v19 }
  0xcb   :  { %v100_v21 = vsel %vm86_vm4, inf, %v99_v20 }
  0xcc   :  { %34 = vxpose.xlu0.b32.start.end [1/1] (short) (narrow) %v100_v21, 8 }
 0x14c   :  { %v50_v22 = vpop.trf.xlu0 }
 0x14d   :  { %67 = vst.msk [vmem:[#allocation5] sm:$0x1] %vm66_vm5, %v50_v22 }
 0x14e   :  { %141 = shalt.err (!%p138_p12)
}
 0x14f   :  { %s142_s23 = scalar_lea.hbm %s193_s1, 16 }
 0x150   :  { %p143_p13 = scmp.ne.s32.totalorder %s193_s1, %s142_s23  ;;  %p146_p0 = scmp.lt.u32.totalorder %s142_s23, %s193_s1 }
 0x152   :  { %p148_p1 = pnand %p146_p0, %p143_p13 }
 0x154   :  { %151 = shalt.err (!%p148_p1)
}
 0x155   :  { %77 = dma.vmem_to_hbm [thread:$0]  %s75_s18, 16, %s193_s1, [#allocation4]  }
 0x156   :  { %154 = dma.done.wait [#allocation4], 16  }
 0x157   :  { %155 = vsyncadd [#allocation4], 4294967280 }
 0x158   :  { %81 = vsyncpa [#allocation3], 1 }
 0x159   :  { %82 = vsyncpa [#allocation4], 1 }

</bundles_post_ra>
